<compile_context>
chip_gen: v7x
topology: tpu7x:2x2x1
jax: 0.10.0
libtpu: 0.0.40
codegen_flags: <defaults>
</compile_context>

<pallas_src>
import jax
import jax.numpy as jnp
import numpy as np
from jax.experimental import pallas as pl
from jax.experimental.pallas import tpu as pltpu


# ---------------------------------------------------------------- helpers
def _round_up(x: int, m: int) -> int:
    return (x + m - 1) // m * m


def _sublane_align(dtype) -> int:
    # Minimum sublane multiple: 8 for 32-bit, 16 for 16-bit, 32 for 8-bit.
    itemsize = jnp.dtype(dtype).itemsize
    return {4: 8, 2: 16, 1: 32}.get(itemsize, 8)


_LANES = 512                       # lane-dense tile width (multiple of 128)
_FAST_PATH_MAX_BYTES = 256 * 1024  # below this, let XLA fuse instead of Pallas


def _compiler_params(n_grid_axes: int) -> pltpu.CompilerParams:
    return pltpu.CompilerParams(
        dimension_semantics=("parallel",) * n_grid_axes,
        vmem_limit_bytes=32 * 1024 * 1024,  # safe on v5e/v6e (128 MiB) and v7x (64 MiB)
    )


# ---------------------------------------------------------------- kernels
def _add_kernel(a_ref, b_ref, o_ref):
    # Elementwise skip-add on fully packed (block_rows, 512) lane-dense tiles.
    o_ref[...] = a_ref[...] + b_ref[...]


def _cat_kernel(a_ref, b_ref, o_ref):
    # Channel concat on the sublane axis: full-lane-width stores for any shape.
    c1 = a_ref.shape[1]
    o_ref[:, :c1, :] = a_ref[...]
    o_ref[:, c1:, :] = b_ref[...]


# ---------------------------------------------------------------- add path
def _pallas_add(a, b, out_dtype):
    orig_shape = a.shape
    n = int(np.prod(orig_shape))
    a1 = a.reshape(-1).astype(out_dtype)
    b1 = b.reshape(-1).astype(out_dtype)

    align = _sublane_align(out_dtype)
    rows_needed = _round_up(pl.cdiv(n, _LANES), align)
    block_rows = min(8 * align, rows_needed)        # ~128 KiB / block at f32
    rows = _round_up(rows_needed, block_rows)
    n_pad = rows * _LANES
    if n_pad != n:
        a1 = jnp.pad(a1, (0, n_pad - n))
        b1 = jnp.pad(b1, (0, n_pad - n))
    a2 = a1.reshape(rows, _LANES)
    b2 = b1.reshape(rows, _LANES)

    grid = (rows // block_rows,)
    spec = pl.BlockSpec((block_rows, _LANES), lambda i: (i, 0))
    itemsize = jnp.dtype(out_dtype).itemsize

    out = pl.pallas_call(
        _add_kernel,
        grid=grid,
        in_specs=[spec, spec],
        out_specs=spec,
        out_shape=jax.ShapeDtypeStruct((rows, _LANES), out_dtype),
        input_output_aliases={0: 0},
        compiler_params=_compiler_params(1),
        cost_estimate=pl.CostEstimate(
            flops=n, bytes_accessed=3 * n_pad * itemsize, transcendentals=0),
    )(a2, b2)
    return out.reshape(-1)[:n].reshape(orig_shape)


# ---------------------------------------------------------------- cat path
def _pick_lane_tile(hw: int) -> int:
    # Largest 128-multiple divisor up to 2048, else use the full extent
    # (full-extent last dim is always a legal block dim).
    if hw % 128 != 0:
        return hw
    for cand in (2048, 1024, 512, 256, 128):
        if hw % cand == 0:
            return cand
    return hw


def _pallas_cat(a, b, out_dtype):
    bsz, c1 = a.shape[0], a.shape[1]
    c2 = b.shape[1]
    spatial = a.shape[2:]
    hw = int(np.prod(spatial)) if spatial else 1
    a3 = a.reshape(bsz, c1, hw).astype(out_dtype)
    b3 = b.reshape(bsz, c2, hw).astype(out_dtype)

    hw_tile = _pick_lane_tile(hw)
    grid = (bsz, hw // hw_tile)
    itemsize = jnp.dtype(out_dtype).itemsize
    n_total = bsz * (c1 + c2) * hw

    out = pl.pallas_call(
        _cat_kernel,
        grid=grid,
        in_specs=[
            pl.BlockSpec((1, c1, hw_tile), lambda bi, hi: (bi, 0, hi)),
            pl.BlockSpec((1, c2, hw_tile), lambda bi, hi: (bi, 0, hi)),
        ],
        out_specs=pl.BlockSpec((1, c1 + c2, hw_tile), lambda bi, hi: (bi, 0, hi)),
        out_shape=jax.ShapeDtypeStruct((bsz, c1 + c2, hw), out_dtype),
        compiler_params=_compiler_params(2),
        cost_estimate=pl.CostEstimate(
            flops=0, bytes_accessed=2 * n_total * itemsize, transcendentals=0),
    )(a3, b3)
    return out.reshape((bsz, c1 + c2) + spatial)


# ---------------------------------------------------------------- wrapper
def skip_connect(x_main, x_aux, connect: str, *, force_pallas: bool = False):
    """Forward pass of Skip_connect. x_main/x_aux: (B, C, H, W)-like arrays."""
    out_dtype = jnp.result_type(x_main.dtype, x_aux.dtype)
    itemsize = jnp.dtype(out_dtype).itemsize

    if connect == "add":
        assert x_main.shape == x_aux.shape
        total_bytes = (x_main.size + x_aux.size) * itemsize
        if total_bytes < _FAST_PATH_MAX_BYTES and not force_pallas:
            # Tiny tensors: let XLA fuse the add into neighbouring ops.
            return x_main.astype(out_dtype) + x_aux.astype(out_dtype)
        return _pallas_add(x_main, x_aux, out_dtype)

    elif connect == "cat":
        assert x_main.shape[0] == x_aux.shape[0]
        assert x_main.shape[2:] == x_aux.shape[2:]
        total_bytes = (x_main.size + x_aux.size) * itemsize
        if total_bytes < _FAST_PATH_MAX_BYTES and not force_pallas:
            return jnp.concatenate(
                (x_main.astype(out_dtype), x_aux.astype(out_dtype)), axis=1)
        return _pallas_cat(x_main, x_aux, out_dtype)

    raise ValueError(f"unsupported connect mode: {connect!r}")


# ---------------------------------------------------------------- reference
def reference_skip_connect(x_main, x_aux, connect: str):
    if connect == "add":
        return x_main + x_aux
    elif connect == "cat":
        return jnp.concatenate((x_main, x_aux), axis=1)
    raise ValueError(connect)


if __name__ == "__main__":
    key = jax.random.PRNGKey(0)
    k1, k2, k3, k4, k5, k6 = jax.random.split(key, 6)

    # Small shapes consistent with a conv-backbone skip connection.
    x_main = jax.random.normal(k1, (2, 4, 16, 16), jnp.float32)
    x_aux = jax.random.normal(k2, (2, 4, 16, 16), jnp.float32)

    # --- connect = 'add' (Pallas path) ---
    out_add = jax.block_until_ready(
        skip_connect(x_main, x_aux, "add", force_pallas=True))
    ref_add = reference_skip_connect(x_main, x_aux, "add")
    assert out_add.shape == (2, 4, 16, 16)
    np.testing.assert_allclose(np.asarray(out_add), np.asarray(ref_add),
                               rtol=1e-6, atol=1e-6)

    # --- connect = 'cat' (Pallas path) ---
    out_cat = jax.block_until_ready(
        skip_connect(x_main, x_aux, "cat", force_pallas=True))
    ref_cat = reference_skip_connect(x_main, x_aux, "cat")
    assert out_cat.shape == (2, 8, 16, 16)
    np.testing.assert_allclose(np.asarray(out_cat), np.asarray(ref_cat),
                               rtol=1e-6, atol=1e-6)

    # --- non-128-aligned spectrogram-like shapes (shape-agnostic paths) ---
    y_main = jax.random.normal(k3, (2, 3, 9, 20), jnp.float32)   # H*W = 180
    y_aux = jax.random.normal(k4, (2, 3, 9, 20), jnp.float32)
    out_add2 = jax.block_until_ready(
        skip_connect(y_main, y_aux, "add", force_pallas=True))
    np.testing.assert_allclose(
        np.asarray(out_add2),
        np.asarray(reference_skip_connect(y_main, y_aux, "add")),
        rtol=1e-6, atol=1e-6)

    z_main = jax.random.normal(k5, (2, 3, 9, 20), jnp.float32)
    z_aux = jax.random.normal(k6, (2, 5, 9, 20), jnp.float32)    # C1 != C2
    out_cat2 = jax.block_until_ready(
        skip_connect(z_main, z_aux, "cat", force_pallas=True))
    assert out_cat2.shape == (2, 8, 9, 20)
    np.testing.assert_allclose(
        np.asarray(out_cat2),
        np.asarray(reference_skip_connect(z_main, z_aux, "cat")),
        rtol=1e-6, atol=1e-6)

    # --- small-tensor fast path (XLA-fused, no Pallas) still matches ---
    out_fast = jax.block_until_ready(skip_connect(x_main, x_aux, "add"))
    np.testing.assert_allclose(np.asarray(out_fast), np.asarray(ref_add),
                               rtol=1e-6, atol=1e-6)

    print("KERNEL_OK")
</pallas_src>

<mosaic_0001>
module attributes {stable_mosaic.version = 11 : i64} {
  func.func @_add_kernel(%arg0: i32, %arg1: memref<8x512xf32, #tpu.memory_space<vmem>>, %arg2: memref<8x512xf32, #tpu.memory_space<vmem>>, %arg3: memref<8x512xf32, #tpu.memory_space<vmem>>) attributes {dimension_semantics = [#tpu.dimension_semantics<parallel>], iteration_bounds = array<i64: 1>, scalar_prefetch = 0 : i64, scratch_operands = 0 : i64, tpu.core_type = #tpu.core_type<tc>, window_params = [{transform_indices = @transform_0, window_bounds = array<i64: 8, 512>}, {transform_indices = @transform_1, window_bounds = array<i64: 8, 512>}, {transform_indices = @transform_2, window_bounds = array<i64: 8, 512>}]} {
    %c0 = arith.constant 0 : index
    %c0_0 = arith.constant 0 : index
    %0 = vector.load %arg1[%c0, %c0_0] : memref<8x512xf32, #tpu.memory_space<vmem>>, vector<8x512xf32>
    %c0_1 = arith.constant 0 : index
    %c0_2 = arith.constant 0 : index
    %1 = vector.load %arg2[%c0_1, %c0_2] : memref<8x512xf32, #tpu.memory_space<vmem>>, vector<8x512xf32>
    %2 = arith.addf %0, %1 : vector<8x512xf32>
    %c0_3 = arith.constant 0 : index
    %c0_4 = arith.constant 0 : index
    %3 = vector.load %arg3[%c0_3, %c0_4] : memref<8x512xf32, #tpu.memory_space<vmem>>, vector<8x512xf32>
    tpu.vector_store %arg3[%c0_3, %c0_4], %2 {strides = array<i32>} : memref<8x512xf32, #tpu.memory_space<vmem>>, vector<8x512xf32>,
    return
  }
  func.func @transform_0(%arg0: i32) -> (i32, i32) {
    %c0_i32 = arith.constant 0 : i32
    %c0_i32_0 = arith.constant 0 : i32
    return %arg0, %c0_i32 : i32, i32
  }
  func.func @transform_1(%arg0: i32) -> (i32, i32) {
    %c0_i32 = arith.constant 0 : i32
    %c0_i32_0 = arith.constant 0 : i32
    return %arg0, %c0_i32 : i32, i32
  }
  func.func @transform_2(%arg0: i32) -> (i32, i32) {
    %c0_i32 = arith.constant 0 : i32
    %c0_i32_0 = arith.constant 0 : i32
    return %arg0, %c0_i32 : i32, i32
  }
}

</mosaic_0001>

<bundles_post_ra>
// kernel: tpu_custom_call.1
= control target key start
LH: loop header
LB: loop body
LE: loop exit
PB: predicated region body
PF: predicated region fallthrough
CT: control target
= control target key end

     0   :  { %7 = vsyncpa [#allocation3], 0  ;;  %s158_s0 = inlined_call_operand.hbm [shape: f32[8,512], index: 0, kind: input, shape index: {}, may-alias: {0,2}]   ;;  %s159_s1 = inlined_call_operand.vmem [shape: f32[8,512], index: 1, kind: input, shape index: {}]   ;;  %s160_s2 = inlined_call_operand.hbm [shape: f32[8,512], index: 2, kind: output, shape index: {}, may-alias: {0,2}]  }
   0x1   :  { %8 = vsyncpa [#allocation4], 0  ;;  %s105_s9 = smov [#allocation2]   ;;  %s57_s13 = scalar_lea.hbm %s158_s0, 512 }
   0x2   :  { %s15_s10 = sshll.u32 %s105_s9, 4  ;;  %p58_p0 = scmp.ne.s32.totalorder %s158_s0, %s57_s13  ;;  %s16_s10 = int_to_ptr.vmem [resolvable:$true] %s15_s10 }
   0x3   :  { %p61_p1 = scmp.lt.u32.totalorder %s57_s13, %s158_s0 }
   0x5   :  { %p63_p2 = pnand %p61_p1, %p58_p0 }
   0x7   :  { %66 = shalt.err (!%p63_p2)
}
   0x8   :  { %s67_s18 = scalar_lea.vmem %s16_s10, 512  ;;  %p72_p4 = scmp.lt.s32.totalorder %s16_s10, %s16_s10 }
   0x9   :  { %p68_p3 = scmp.ne.s32.totalorder %s16_s10, %s67_s18  ;;  %p73_p5 = scmp.lt.s32.totalorder %s67_s18, %s67_s18 }
   0xb   :  { %p74_p6 = por %p73_p5, %p72_p4 }
   0xd   :  { %p75_p7 = pnand %p74_p6, %p68_p3 }
   0xf   :  { %78 = shalt.err (!%p75_p7)
}
  0x10   :  { %18 = dma.hbm_to_vmem [thread:$0]  %s158_s0, 512, %s16_s10, [#allocation3]  }
  0x11   :  { %101 = dma.done.wait [#allocation3], 512  }
  0x12   :  { %102 = vsyncadd [#allocation3], 4294966784  ;;  %v24_v0 = vld [vmem:[#allocation2] sm:$0xff]  ;;  %v25_v2 = vld [vmem:[#allocation2 + $0x8] sm:$0xff]  ;;  %s106_s23 = smov [#allocation5]  }
  0x13   :  { %v28_v1 = vld [vmem:[%s159_s1] sm:$0xff]  ;;  %s46_s24 = sshll.u32 %s106_s23, 4  ;;  %v29_v4 = vld [vmem:[%s159_s1 + $0x8] sm:$0xff]  ;;  %v26_v5 = vld [vmem:[#allocation2 + $0x10] sm:$0xff]  ;;  %s47_s24 = int_to_ptr.vmem [resolvable:$true] %s46_s24 }
  0x14   :  { %v32_v3 = vadd.f32 %v28_v1, %v24_v0  ;;  %v30_v6 = vld [vmem:[%s159_s1 + $0x10] sm:$0xff]  ;;  %v33_v7 = vadd.f32 %v29_v4, %v25_v2  ;;  %v27_v9 = vld [vmem:[#allocation2 + $0x18] sm:$0xff]  ;;  %s79_s30 = scalar_lea.vmem %s47_s24, 512  ;;  %p84_p9 = scmp.lt.s32.totalorder %s47_s24, %s47_s24 }
  0x15   :  { %v34_v8 = vadd.f32 %v30_v6, %v26_v5  ;;  %v31_v10 = vld [vmem:[%s159_s1 + $0x18] sm:$0xff]  ;;  %p80_p8 = scmp.ne.s32.totalorder %s47_s24, %s79_s30  ;;  %p85_p10 = scmp.lt.s32.totalorder %s79_s30, %s79_s30 }
  0x16   :  { %36 = vst [vmem:[#allocation5] sm:$0xff] %v32_v3  ;;  %v35_v11 = vadd.f32 %v31_v10, %v27_v9  ;;  %37 = vst [vmem:[#allocation5 + $0x8] sm:$0xff] %v33_v7 }
  0x17   :  { %38 = vst [vmem:[#allocation5 + $0x10] sm:$0xff] %v34_v8  ;;  %p86_p11 = por %p85_p10, %p84_p9 }
  0x18   :  { %39 = vst [vmem:[#allocation5 + $0x18] sm:$0xff] %v35_v11 }
  0x19   :  { %p87_p12 = pnand %p86_p11, %p80_p8 }
  0x1b   :  { %90 = shalt.err (!%p87_p12)
}
  0x1c   :  { %s91_s5 = scalar_lea.hbm %s160_s2, 512 }
  0x1d   :  { %p92_p13 = scmp.ne.s32.totalorder %s160_s2, %s91_s5  ;;  %p95_p0 = scmp.lt.u32.totalorder %s91_s5, %s160_s2 }
  0x1f   :  { %p97_p1 = pnand %p95_p0, %p92_p13 }
  0x21   :  { %100 = shalt.err (!%p97_p1)
}
  0x22   :  { %49 = dma.vmem_to_hbm [thread:$0]  %s47_s24, 512, %s160_s2, [#allocation4]  }
  0x23   :  { %103 = dma.done.wait [#allocation4], 512  }
  0x24   :  { %104 = vsyncadd [#allocation4], 4294966784 }
  0x25   :  { %53 = vsyncpa [#allocation3], 1 }
  0x26   :  { %54 = vsyncpa [#allocation4], 1 }

</bundles_post_ra>
